<compile_context>
chip_gen: v7x
topology: tpu7x:2x2x1
jax: 0.10.0
libtpu: 0.0.40
codegen_flags: <defaults>
</compile_context>

<pallas_src>
import jax
import jax.numpy as jnp
from jax.experimental import pallas as pl
from jax.experimental.pallas import tpu as pltpu


def _add_kernel(q_ref, s_ref, o_ref):
    # q_ref / o_ref: (1, Ns, TR, L) ; s_ref: (Ns, 1, TR, L)
    # Leading-axis squeezes only, so both operands land with identical layouts
    # and the add is a single dense elementwise VPU op over the whole block.
    o_ref[0] = q_ref[0] + s_ref[:, 0]


def _choose_split(C, H, W):
    """Split C*H*W into (rows, lanes) with lanes a multiple of 128 if possible."""
    F = C * H * W
    if F % 128 == 0:
        max_lanes = min(2048, F)
        if (F // 8) >= 128:
            # prefer >= 8 rows so sublanes are dense too
            max_lanes = min(max_lanes, (F // 8) // 128 * 128)
        k = max_lanes // 128
        while k >= 1:
            L = k * 128
            if F % L == 0:
                return F // L, L
            k -= 1
    # Fallback: keep the natural (C, H*W) split. Blocks stay legal because the
    # trailing block dim equals the full array dim (masked stores accepted).
    # This path is only hit for odd C*H*W, which in practice are tiny levels
    # that take the non-Pallas fast path anyway.
    return C, H * W


def _row_tile(R, Ns, L, itemsize, target_bytes=2 << 20):
    """Pick a row-tile so one block is ~target_bytes per array, (8,128)-legal."""
    sub = 8 * max(1, 4 // itemsize)       # sublane multiple (f32: 8, bf16: 16)
    per_row = Ns * L * itemsize
    tr = max(1, target_bytes // per_row)
    if tr >= R:
        return R                           # full dim -> always legal
    tr = max(sub, (tr // sub) * sub)       # multiple of the sublane tile
    return min(tr, R)                      # == R (full dim) if R < sub


def add_fusion_level(query, support, *, min_pallas_bytes=1 << 20):
    """query: (B, Ns, C, H, W); support: (Ns, B, C, H, W) -> (B, Ns, C, H, W)."""
    B, Ns, C, Hq, Wq = query.shape
    Ns_s, B_s, C_s, Hs, Ws = support.shape
    assert Hs == Hq and Ws == Wq, "Incompatible attention for this fusion module"
    assert Ns_s == Ns and B_s == B and C_s == C
    assert query.dtype == support.dtype

    nbytes = query.size * query.dtype.itemsize
    if nbytes < min_pallas_bytes:
        # Tiny level: kernel launch / pipeline overhead dwarfs the HBM traffic;
        # XLA's fused transpose+add is already optimal here.
        return query + jnp.swapaxes(support, 0, 1)

    R, L = _choose_split(C, Hq, Wq)
    TR = _row_tile(R, Ns, L, query.dtype.itemsize)

    # Pure trailing-dim reshapes on contiguous arrays: no data movement.
    q2 = query.reshape(B, Ns, R, L)
    s2 = support.reshape(Ns, B, R, L)

    grid = (B, pl.cdiv(R, TR))

    out = pl.pallas_call(
        _add_kernel,
        out_shape=jax.ShapeDtypeStruct((B, Ns, R, L), query.dtype),
        grid_spec=pltpu.PrefetchScalarGridSpec(
            num_scalar_prefetch=0,
            grid=grid,
            in_specs=[
                # query tile: whole Ns fan-in per batch element
                pl.BlockSpec((1, Ns, TR, L), lambda b, r: (b, 0, r, 0)),
                # support tile: permute(1,0,...) expressed by swapping indices
                pl.BlockSpec((Ns, 1, TR, L), lambda b, r: (0, b, r, 0)),
            ],
            out_specs=pl.BlockSpec((1, Ns, TR, L), lambda b, r: (b, 0, r, 0)),
        ),
        compiler_params=pltpu.CompilerParams(
            dimension_semantics=("parallel", "parallel"),
            vmem_limit_bytes=32 * 1024 * 1024,
        ),
    )(q2, s2)

    return out.reshape(B, Ns, C, Hq, Wq)


def add_fusion_forward(features, *, min_pallas_bytes=1 << 20):
    """Mirrors ADD.forward: operates on lists of per-level feature tensors."""
    query_features = features["query_p2"]
    support_features = features["support_p2"]
    merged = [
        add_fusion_level(q, s, min_pallas_bytes=min_pallas_bytes)
        for q, s in zip(query_features, support_features)
    ]
    out = dict(features)
    out["output_features"] = merged
    return out


if __name__ == "__main__":
    key = jax.random.PRNGKey(0)
    B, Ns, C = 2, 3, 4
    kq1, ks1, kq2, ks2, kq3, ks3 = jax.random.split(key, 6)

    # level 0: 16x16 spatial -> lane-dense (8, 128) split
    q1 = jax.random.normal(kq1, (B, Ns, C, 16, 16), dtype=jnp.float32)
    s1 = jax.random.normal(ks1, (Ns, B, C, 16, 16), dtype=jnp.float32)
    # level 1: 7x7 spatial, C*H*W not a multiple of 128 -> (C, H*W) fallback split
    q2 = jax.random.normal(kq2, (B, Ns, 8, 7, 7), dtype=jnp.float32)
    s2 = jax.random.normal(ks2, (Ns, B, 8, 7, 7), dtype=jnp.float32)
    # level 2: larger lane-dense level (exercises the multi-row / wide-lane split)
    q3 = jax.random.normal(kq3, (B, Ns, 32, 16, 16), dtype=jnp.float32)
    s3 = jax.random.normal(ks3, (Ns, B, 32, 16, 16), dtype=jnp.float32)

    features = {
        "query_p2": [q1, q2, q3],
        "support_p2": [s1, s2, s3],
        "support_targets": None,  # unused by ADD fusion
    }

    # Force the Pallas path even for these tiny demo tensors so the kernel runs.
    out_features = add_fusion_forward(features, min_pallas_bytes=0)
    outs = jax.block_until_ready(out_features["output_features"])

    refs = [
        q1 + jnp.transpose(s1, (1, 0, 2, 3, 4)),
        q2 + jnp.transpose(s2, (1, 0, 2, 3, 4)),
        q3 + jnp.transpose(s3, (1, 0, 2, 3, 4)),
    ]
    for o, r, q in zip(outs, refs, [q1, q2, q3]):
        assert o.shape == q.shape
        assert jnp.allclose(o, r), "mismatch vs reference (pallas path)"

    # Default small-level fallback path must also match.
    out_fb = add_fusion_forward(features)["output_features"]
    for o, r in zip(out_fb, refs):
        assert jnp.allclose(o, r), "mismatch vs reference (fallback path)"

    print("KERNEL_OK")
</pallas_src>

<mosaic_0001>
module attributes {stable_mosaic.version = 11 : i64} {
  func.func @_add_kernel(%arg0: i32, %arg1: i32, %arg2: memref<1x3x8x128xf32, #tpu.memory_space<vmem>>, %arg3: memref<3x1x8x128xf32, #tpu.memory_space<vmem>>, %arg4: memref<1x3x8x128xf32, #tpu.memory_space<vmem>>) attributes {dimension_semantics = [#tpu.dimension_semantics<parallel>, #tpu.dimension_semantics<parallel>], iteration_bounds = array<i64: 2, 1>, scalar_prefetch = 0 : i64, scratch_operands = 0 : i64, tpu.core_type = #tpu.core_type<tc>, window_params = [{transform_indices = @transform_0, window_bounds = array<i64: 1, 3, 8, 128>}, {transform_indices = @transform_1, window_bounds = array<i64: 3, 1, 8, 128>}, {transform_indices = @transform_2, window_bounds = array<i64: 1, 3, 8, 128>}]} {
    %c0 = arith.constant 0 : index
    %c0_0 = arith.constant 0 : index
    %c0_1 = arith.constant 0 : index
    %c0_2 = arith.constant 0 : index
    %0 = vector.load %arg2[%c0, %c0_0, %c0_1, %c0_2] : memref<1x3x8x128xf32, #tpu.memory_space<vmem>>, vector<1x3x8x128xf32>
    %1 = vector.shape_cast %0 : vector<1x3x8x128xf32> to vector<3x8x128xf32>
    %c0_3 = arith.constant 0 : index
    %c0_4 = arith.constant 0 : index
    %c0_5 = arith.constant 0 : index
    %c0_6 = arith.constant 0 : index
    %2 = vector.load %arg3[%c0_3, %c0_4, %c0_5, %c0_6] : memref<3x1x8x128xf32, #tpu.memory_space<vmem>>, vector<3x1x8x128xf32>
    %3 = vector.shape_cast %2 : vector<3x1x8x128xf32> to vector<3x8x128xf32>
    %4 = arith.addf %1, %3 : vector<3x8x128xf32>
    %c0_7 = arith.constant 0 : index
    %c0_8 = arith.constant 0 : index
    %c0_9 = arith.constant 0 : index
    %c0_10 = arith.constant 0 : index
    %5 = vector.load %arg4[%c0_7, %c0_8, %c0_9, %c0_10] : memref<1x3x8x128xf32, #tpu.memory_space<vmem>>, vector<1x3x8x128xf32>
    %6 = vector.shape_cast %5 : vector<1x3x8x128xf32> to vector<3x8x128xf32>
    %7 = vector.shape_cast %4 : vector<3x8x128xf32> to vector<1x3x8x128xf32>
    tpu.vector_store %arg4[%c0_7, %c0_8, %c0_9, %c0_10], %7 {strides = array<i32>} : memref<1x3x8x128xf32, #tpu.memory_space<vmem>>, vector<1x3x8x128xf32>,
    return
  }
  func.func @transform_0(%arg0: i32, %arg1: i32) -> (i32, i32, i32, i32) {
    %c0_i32 = arith.constant 0 : i32
    %c0_i32_0 = arith.constant 0 : i32
    %c0_i32_1 = arith.constant 0 : i32
    return %arg0, %c0_i32, %arg1, %c0_i32_0 : i32, i32, i32, i32
  }
  func.func @transform_1(%arg0: i32, %arg1: i32) -> (i32, i32, i32, i32) {
    %c0_i32 = arith.constant 0 : i32
    %c0_i32_0 = arith.constant 0 : i32
    %c0_i32_1 = arith.constant 0 : i32
    return %c0_i32, %arg0, %arg1, %c0_i32_0 : i32, i32, i32, i32
  }
  func.func @transform_2(%arg0: i32, %arg1: i32) -> (i32, i32, i32, i32) {
    %c0_i32 = arith.constant 0 : i32
    %c0_i32_0 = arith.constant 0 : i32
    %c0_i32_1 = arith.constant 0 : i32
    return %arg0, %c0_i32, %arg1, %c0_i32_0 : i32, i32, i32, i32
  }
}

</mosaic_0001>

<bundles_post_ra>
// kernel: tpu_custom_call.1
= control target key start
LH: loop header
LB: loop body
LE: loop exit
PB: predicated region body
PF: predicated region fallthrough
CT: control target
= control target key end

     0   :  { %7 = vsyncpa [#allocation3], 0  ;;  %s847_s0 = inlined_call_operand.hbm [shape: f32[2,3,8,128], index: 0, kind: input, shape index: {}]   ;;  %s848_s1 = inlined_call_operand.hbm [shape: f32[3,2,8,128], index: 1, kind: input, shape index: {}]   ;;  %s849_s2 = inlined_call_operand.hbm [shape: f32[2,3,8,128], index: 2, kind: output, shape index: {}]  }
   0x1   :  { %9 = vsyncpa [#allocation3 + $0x1], 0 }
   0x2   :  { %10 = vsyncpa [#allocation6], 0 }
   0x3   :  { %12 = vsyncpa [#allocation6 + $0x1], 0 }
   0x4   :  { %13 = vsyncpa [#allocation4], 0 }
   0x5   :  { %15 = vsyncpa [#allocation4 + $0x1], 0  ;;  %s615_s9 = smov 0   ;;  %s617_s10 = smov 0  }
   0x6   :  { %s619_s11 = smov 0   ;;  %s621_s12 = smov 0  }
   0x7   :  { %s623_s13 = smov 0   ;;  %s625_s14 = smov 0  }
   0x8 LB: > { %s357_s15 = sadd.s32 4294967295, %s590_s14   ;;  %s358_s16 = sadd.s32 4294967294, %s590_s14   ;;  %s590_s14 = sphi %s625_s14, %s21_s14   ;;  %s586_s13 = sphi %s623_s13, %s867_s13   ;;  %s582_s12 = sphi %s621_s12, %s866_s12   ;;  %s578_s11 = sphi %s619_s11, %s865_s11   ;;  %s574_s10 = sphi %s617_s10, %s864_s10   ;;  %s570_s9 = sphi %s615_s9, %s863_s9  }
   0x9   : > { %s33_s17 = sadd.s32 1, %s586_s13  ;;  %s42_s18 = sadd.s32 1, %s578_s11 }
   0xa   : > { %p35_p0 = scmp.ge.s32.totalorder %s33_s17, 2  ;;  %p49_p1 = scmp.ne.s32.totalorder %s578_s11, %s574_s10 }
   0xb   : > { %p50_p2 = scmp.eq.s32.totalorder %s590_s14, 0  ;;  %p55_p3 = scmp.ne.s32.totalorder %s574_s10, %s570_s9 }
   0xc   : > { %s869_s17 = smov (%p35_p0, %s33_s17), 0  ;;  %p56_p5 = scmp.eq.s32.totalorder %s357_s15, 0 }
   0xd   : > { %p656_p4 = por %p50_p2, %p49_p1  ;;  %s37_s20 = ssub.s32 %s586_s13, %s869_s17 }
   0xe   : > { %p109_p6 = scmp.eq.s32.totalorder %s357_s15, 1  ;;  %p40_p7 = scmp.eq.s32.totalorder %s37_s20, 0 }
   0xf   : > { %p662_p8 = por %p56_p5, %p55_p3  ;;  %p115_p10 = scmp.eq.s32.totalorder %s358_s16, 1 }
  0x10   : > { %p666_p9 = por %p109_p6, %p49_p1  ;;  %p389_p13 = scmp.lt.s32.totalorder %s590_s14, 2 }
  0x11   : > { %s853_s21 = scalar_select %p662_p8, 1, 0 }
  0x12   : > { %s854_s22 = scalar_select %p666_p9, 1, 0 }
  0x13   : > { %s671_s23 = scalar_select %p40_p7, %s578_s11, %s42_s18  }
  0x14   : > { %p673_p11 = por %p115_p10, %p55_p3  ;;  %s680_s25 = sand.u32 1, %s578_s11  }
  0x15   : > { %s367_s26 = smul.u32 24, %s680_s25  ;;  %p686_p0 = pnand %p389_p13, %p656_p4 }
  0x16   : > { %s855_s24 = scalar_select %p673_p11, 1, 0 }
  0x17   : > { %s368_s27 = smul.u32 384, %s586_s13  ;;  %s139_s4 = scalar_lea.vmem [#allocation2], %s367_s26 }
  0x18   : > { %s147_s5 = sshll.u32 %s139_s4, 4  ;;  %s136_s6 = scalar_lea.sflag [#allocation3], %s680_s25  ;;  %s697_s5 = int_to_ptr.vmem [resolvable:$true] %s147_s5 }
  0x19   : > { %s693_s3 = scalar_lea.hbm %s847_s0, %s368_s27  ;;  %p446_p3 = pneg %p686_p0 }
  0x1a   : > { %s444_s7 = scalar_lea.hbm %s693_s3, 384  ;;  %s449_s16 = scalar_lea.hbm %s847_s0, 768 }
  0x1b   : > { %p445_p2 = scmp.ne.s32.totalorder %s693_s3, %s444_s7  ;;  %p450_p6 = scmp.lt.u32.totalorder %s693_s3, %s847_s0 }
  0x1c   : > { %p451_p7 = scmp.lt.u32.totalorder %s449_s16, %s444_s7  ;;  %p453_p13 = scmp.lt.u32.totalorder %s444_s7, %s693_s3 }
  0x1d   : > { %p447_p4 = pnand %p446_p3, %p445_p2 }
  0x1e   : > { %p452_p10 = por %p451_p7, %p450_p6 }
  0x1f   : > { %p448_p5 = pneg %p447_p4 }
  0x20   : > { %p454_p12 = por %p453_p13, %p452_p10 }
  0x22   : > { %p455_p1 = pnand %p454_p12, %p448_p5 }
  0x24   : > { %458 = shalt.err (!%p455_p1)
}
  0x25   : > { %s459_s20 = scalar_lea.vmem %s697_s5, 384  ;;  %s592_s27 = smov [#allocation2]  }
  0x26   : > { %p460_p2 = scmp.ne.s32.totalorder %s697_s5, %s459_s20  ;;  %s464_s29 = sshll.u32 %s592_s27, 4  ;;  %s465_s29 = int_to_ptr.vmem [resolvable:$false] %s464_s29 }
  0x27   : > { %s466_s30 = scalar_lea.vmem %s465_s29, 768  ;;  %p467_p9 = scmp.lt.s32.totalorder %s697_s5, %s465_s29 }
  0x28   : > { %p462_p4 = pnand %p460_p2, %p446_p3  ;;  %p468_p6 = scmp.lt.s32.totalorder %s466_s30, %s459_s20 }
  0x2a   : > { %p463_p11 = pneg %p462_p4  ;;  %p469_p7 = por %p468_p6, %p467_p9 }
  0x2c   : > { %p470_p10 = pnand %p469_p7, %p463_p11 }
  0x2e   : > { %473 = shalt.err (!%p470_p10)
}
  0x2f   : > { %s593_s4 = smov 128   ;;  %s594_s7 = smov 8  }
  0x30   : > { %381 = dma.hbm_to_vmem [thread:$0]  (!%p686_p0), %s693_s3, 384, %s697_s5, %s136_s6, %s593_s4, %s593_s4, %s594_s7  }
  0x31   : > { %p176_p9 = scmp.lt.s32.totalorder %s590_s14, 3  ;;  %s362_s8 = sshll.u32 %s586_s13, 7 }
  0x32   : > { %p857_p11 = scmp.ge.s32.totalorder %s590_s14, 1  ;;  %s742_s19 = scalar_lea.hbm %s848_s1, %s362_s8 }
  0x33   : > { %s161_s20 = scalar_lea.vmem [#allocation5], %s367_s26  ;;  %s158_s3 = scalar_lea.sflag [#allocation6], %s680_s25 }
  0x34   : > { %p735_p12 = pnand %p857_p11, %p176_p9  ;;  %s168_s27 = sshll.u32 %s161_s20, 4  ;;  %s746_s27 = int_to_ptr.vmem [resolvable:$true] %s168_s27 }
  0x35   : > { %s474_s5 = scalar_lea.hbm %s742_s19, 384  ;;  %s479_s30 = scalar_lea.hbm %s848_s1, 768 }
  0x36   : > { %p475_p1 = scmp.ne.s32.totalorder %s742_s19, %s474_s5  ;;  %p480_p2 = scmp.lt.u32.totalorder %s742_s19, %s848_s1 }
  0x37   : > { %p481_p4 = scmp.lt.u32.totalorder %s479_s30, %s474_s5  ;;  %p483_p7 = scmp.lt.u32.totalorder %s474_s5, %s742_s19 }
  0x38   : > { %p477_p5 = pnand %p475_p1, %p446_p3 }
  0x39   : > { %p482_p6 = por %p481_p4, %p480_p2 }
  0x3a   : > { %p478_p13 = pneg %p477_p5 }
  0x3b   : > { %p484_p10 = por %p483_p7, %p482_p6 }
  0x3d   : > { %p485_p9 = pnand %p484_p10, %p478_p13 }
  0x3f   : > { %488 = shalt.err (!%p485_p9)
}
  0x40   : > { %s489_s26 = scalar_lea.vmem %s746_s27, 384  ;;  %s595_s18 = smov [#allocation5]  }
  0x41   : > { %p490_p11 = scmp.ne.s32.totalorder %s746_s27, %s489_s26  ;;  %s494_s20 = sshll.u32 %s595_s18, 4  ;;  %s495_s20 = int_to_ptr.vmem [resolvable:$false] %s494_s20 }
  0x42   : > { %s496_s6 = scalar_lea.vmem %s495_s20, 768  ;;  %p497_p8 = scmp.lt.s32.totalorder %s746_s27, %s495_s20 }
  0x43   : > { %p492_p1 = pnand %p490_p11, %p446_p3  ;;  %p498_p2 = scmp.lt.s32.totalorder %s496_s6, %s489_s26 }
  0x45   : > { %p493_p5 = pneg %p492_p1  ;;  %p499_p4 = por %p498_p2, %p497_p8 }
  0x47   : > { %p500_p6 = pnand %p499_p4, %p493_p5 }
  0x49   : > { %503 = shalt.err (!%p500_p6)
}
  0x4a   : > { %s596_s5 = smov 256   ;;  %180 = sbr.rel (%p735_p12) target bundleno = 111 (0x6f), region = 28 }
  0x4b   : > { %384 = dma.hbm_to_vmem [thread:$0]  (!%p686_p0), %s742_s19, 384, %s746_s27, %s158_s3, %s596_s5, %s593_s4, %s594_s7  }
  0x4c   : > { %s779_s29 = sand.u32 (!%p735_p12), 1, %s574_s10   ;;  %p859_p8 = scmp.ne.s32.totalorder (!%p735_p12), %s853_s21, 0 }
  0x4d   : > { %s370_s30 = smul.u32 (!%p735_p12), 24, %s779_s29  ;;  %s183_s8 = scalar_lea.sflag (!%p735_p12), [#allocation3], %s779_s29 }
  0x4f   : > { %s186_s16 = scalar_lea.vmem (!%p735_p12), [#allocation2], %s370_s30 }
  0x51   : > { %557 = dma.done.wait (%p859_p8), %s183_s8, 384  }
  0x52   : > { %559 = vsyncadd (%p859_p8), %s183_s8, 4294966912  ;;  %s192_s25 = scalar_lea.sflag [#allocation6], %s779_s29  ;;  %s195_s28 = scalar_lea.vmem [#allocation5], %s370_s30 }
  0x53   : > { %561 = dma.done.wait (%p859_p8), %s192_s25, 384  }
  0x54   : > { %563 = vsyncadd (%p859_p8), %s192_s25, 4294966912  ;;  %s220_s4 = scalar_lea.vmem [#allocation7], %s370_s30  ;;  %s371_s15 = smul.u32 384, %s582_s12  ;;  %v221_v0 = vld [vmem:[%s186_s16] sm:$0xff]  ;;  %v224_v1 = vld [vmem:[%s195_s28] sm:$0xff] }
  0x55   : > { %s248_s7 = sshll.u32 %s220_s4, 4  ;;  %v222_v2 = vld [vmem:[%s186_s16 + $0x8] sm:$0xff]  ;;  %v227_v3 = vadd.f32 %v224_v1, %v221_v0  ;;  %v225_v4 = vld [vmem:[%s195_s28 + $0x8] sm:$0xff]  ;;  %v223_v5 = vld [vmem:[%s186_s16 + $0x10] sm:$0xff]  ;;  %s234_s12 = scalar_lea.sflag [#allocation4], %s779_s29  ;;  %s793_s7 = int_to_ptr.vmem [resolvable:$true] %s248_s7 }
  0x56   : > { %v226_v6 = vld [vmem:[%s195_s28 + $0x10] sm:$0xff]  ;;  %v228_v7 = vadd.f32 %v225_v4, %v222_v2  ;;  %s798_s27 = scalar_lea.hbm %s849_s2, %s371_s15  ;;  %s504_s3 = scalar_lea.vmem %s793_s7, 384 }
  0x57   : > { %v229_v8 = vadd.f32 %v226_v6, %v223_v5  ;;  %230 = vst [vmem:[%s220_s4] sm:$0xff] %v227_v3  ;;  %p505_p0 = scmp.ne.s32.totalorder %s793_s7, %s504_s3  ;;  %p860_p3 = scmp.ne.s32.totalorder %s854_s22, 0 }
  0x58   : > { %231 = vst [vmem:[%s220_s4 + $0x8] sm:$0xff] %v228_v7  ;;  %s597_s26 = smov [#allocation7]  }
  0x59   : > { %232 = vst [vmem:[%s220_s4 + $0x10] sm:$0xff] %v229_v8  ;;  %p506_p12 = pnand %p505_p0, %p860_p3  ;;  %s508_s18 = sshll.u32 %s597_s26, 4  ;;  %s509_s18 = int_to_ptr.vmem [resolvable:$false] %s508_s18 }
  0x5a   : > { %s510_s20 = scalar_lea.vmem %s509_s18, 768  ;;  %p511_p7 = scmp.lt.s32.totalorder %s793_s7, %s509_s18 }
  0x5b   : > { %p507_p13 = pneg %p506_p12  ;;  %p512_p10 = scmp.lt.s32.totalorder %s510_s20, %s504_s3 }
  0x5d   : > { %p513_p9 = por %p512_p10, %p511_p7 }
  0x5f   : > { %p514_p11 = pnand %p513_p9, %p507_p13 }
  0x61   : > { %517 = shalt.err (!%p514_p11)
}
  0x62   : > { %s518_s6 = scalar_lea.hbm %s798_s27, 384  ;;  %s522_s8 = scalar_lea.hbm %s849_s2, 768 }
  0x63   : > { %p519_p1 = scmp.ne.s32.totalorder %s798_s27, %s518_s6  ;;  %p523_p4 = scmp.lt.u32.totalorder %s798_s27, %s849_s2 }
  0x64   : > { %p524_p6 = scmp.lt.u32.totalorder %s522_s8, %s518_s6  ;;  %p526_p0 = scmp.lt.u32.totalorder %s518_s6, %s798_s27 }
  0x65   : > { %p520_p5 = pnand %p519_p1, %p860_p3 }
  0x66   : > { %p525_p8 = por %p524_p6, %p523_p4 }
  0x67   : > { %p521_p2 = pneg %p520_p5 }
  0x68   : > { %p527_p12 = por %p526_p0, %p525_p8 }
  0x6a   : > { %p528_p13 = pnand %p527_p12, %p521_p2 }
  0x6c   : > { %531 = shalt.err (!%p528_p13)
}
  0x6d   : > { %s598_s28 = smov 128   ;;  %s599_s4 = smov 8  }
  0x6e   : > { %376 = dma.vmem_to_hbm [thread:$0]  (%p860_p3), %s793_s7, 384, %s798_s27, %s234_s12, %s598_s28, %s598_s28, %s599_s4  }
  0x6f PF: > { %s263_s15 = sand.u32 1, %s570_s9   ;;  %p861_p7 = scmp.ne.s32.totalorder %s855_s24, 0 }
  0x70   : > { %p862_p10 = scmp.ge.s32.totalorder %s590_s14, 2  ;;  %s264_s21 = scalar_lea.sflag [#allocation4], %s263_s15 }
  0x72   : > { %p386_p9 = pnand %p862_p10, %p861_p7 }
  0x74   : > { %565 = dma.done.wait (!%p386_p9), %s264_s21, 384  }
  0x75   : > { %567 = vsyncadd (!%p386_p9), %s264_s21, 4294966912  ;;  %s21_s14 = sadd.s32 1, %s590_s14   ;;  %s863_s9 = smov %s574_s10 }
  0x76   : > { %p18_p11 = scmp.ge.s32.totalorder %s21_s14, 4   ;;  %s864_s10 = smov %s578_s11 }
  0x77   : > { %s865_s11 = smov %s671_s23  ;;  %s866_s12 = smov %s586_s13 }
  0x78   : > { %s867_s13 = smov %s869_s17  ;;  %20 = sbr.rel (!%p18_p11) target bundleno = 8 (0x8), region = 86 }
  0x7f   :  { %269 = vsyncpa [#allocation3], 1 }
  0x80   :  { %271 = vsyncpa [#allocation3 + $0x1], 1 }
  0x81   :  { %272 = vsyncpa [#allocation6], 1 }
  0x82   :  { %274 = vsyncpa [#allocation6 + $0x1], 1 }
  0x83   :  { %275 = vsyncpa [#allocation4], 1 }
  0x84   :  { %277 = vsyncpa [#allocation4 + $0x1], 1 }

</bundles_post_ra>
